<compile_context>
chip_gen: v6e
topology: v6e:2x2x1
jax: 0.10.0
libtpu: 0.0.40
codegen_flags: <defaults>
</compile_context>

<pallas_src>
import functools

import jax
import jax.numpy as jnp
from jax.experimental import pallas as pl
from jax.experimental.pallas import tpu as pltpu


def _round_up(x, m):
    return ((x + m - 1) // m) * m


def _mlp_kernel(x_ref, w1_ref, w2_ref, w3_ref, b_ref, o_ref, *, hp, cp):
    # b_ref is the fused bias block: row 0 -> b1, row 1 -> b2, row 2 -> b3
    # (rows 3..7 are zero sublane padding).  Static slices -> no runtime cost.
    # Layer 1 + ReLU
    h1 = jnp.dot(x_ref[...], w1_ref[...], preferred_element_type=jnp.float32)
    h1 = jnp.maximum(h1 + b_ref[0:1, :hp], 0.0)
    # Layer 2 + ReLU
    h2 = jnp.dot(h1.astype(w2_ref.dtype), w2_ref[...],
                 preferred_element_type=jnp.float32)
    h2 = jnp.maximum(h2 + b_ref[1:2, :hp], 0.0)
    # Layer 3 (no activation)
    o = jnp.dot(h2.astype(w3_ref.dtype), w3_ref[...],
                preferred_element_type=jnp.float32)
    o = o + b_ref[2:3, :cp]
    o_ref[...] = o.astype(o_ref.dtype)


def neural_net_forward(x, params, *, batch_tile=128, compute_dtype=jnp.float32):
    """x: [B, input_size] float32. params: dict of (W[in,out], b[1,out]) per layer."""
    w1, b1 = params["l1"]
    w2, b2 = params["l2"]
    w3, b3 = params["l3"]

    B, in_size = x.shape
    hidden = w1.shape[1]
    num_classes = w3.shape[1]

    # Lane-pad contraction / output dims to multiples of 128 (full MXU width,
    # unmasked lane-dense output store).  Zero padding is inert: padded weight
    # rows hit zero activations, padded bias entries are 0, ReLU(0) = 0.
    IP = _round_up(in_size, 128)
    HP = _round_up(hidden, 128)
    CP = _round_up(num_classes, 128)

    # Batch (sublane) tile: multiple of 8; grid over batch for large B so
    # batch tiles can be split across TensorCores and x/out DMAs pipeline
    # behind compute.
    TB = batch_tile if B > batch_tile else _round_up(max(B, 8), 8)
    BP = _round_up(B, TB)
    nb = BP // TB

    def pad2(a, rows, cols):
        return jnp.pad(a, ((0, rows - a.shape[0]), (0, cols - a.shape[1])))

    xp = pad2(x, BP, IP).astype(compute_dtype)
    w1p = pad2(w1, IP, HP).astype(compute_dtype)
    w2p = pad2(w2, HP, HP).astype(compute_dtype)
    w3p = pad2(w3, HP, CP).astype(compute_dtype)

    # Fuse the three bias vectors into one lane-dense, sublane-aligned array
    # -> a single aligned DMA.
    P = max(HP, CP)
    b_all = jnp.zeros((8, P), jnp.float32)
    b_all = b_all.at[0, :hidden].set(b1.reshape(-1))
    b_all = b_all.at[1, :hidden].set(b2.reshape(-1))
    b_all = b_all.at[2, :num_classes].set(b3.reshape(-1))

    kernel = functools.partial(_mlp_kernel, hp=HP, cp=CP)

    out_padded = pl.pallas_call(
        kernel,
        out_shape=jax.ShapeDtypeStruct((BP, CP), jnp.float32),
        grid=(nb,),
        in_specs=[
            pl.BlockSpec((TB, IP), lambda i: (i, 0)),   # x: tiled over batch
            pl.BlockSpec((IP, HP), lambda i: (0, 0)),   # w1: resident
            pl.BlockSpec((HP, HP), lambda i: (0, 0)),   # w2: resident
            pl.BlockSpec((HP, CP), lambda i: (0, 0)),   # w3: resident
            pl.BlockSpec((8, P),  lambda i: (0, 0)),    # fused biases: resident
        ],
        out_specs=pl.BlockSpec((TB, CP), lambda i: (i, 0)),
        compiler_params=pltpu.CompilerParams(
            # Batch tiles are independent -> megacore sharding on v7x.
            dimension_semantics=("parallel",),
        ),
    )(xp, w1p, w2p, w3p, b_all)

    return out_padded[:B, :num_classes]


def init_params(key, input_size, hidden_size, num_classes):
    """Deterministic init mimicking nn.Linear default: U(-1/sqrt(fan_in), 1/sqrt(fan_in))."""
    def linear(k, fan_in, fan_out):
        kw, kb = jax.random.split(k)
        bound = 1.0 / jnp.sqrt(jnp.float32(fan_in))
        # stored as [in, out] (i.e. W.T relative to PyTorch's [out, in])
        w = jax.random.uniform(kw, (fan_in, fan_out), jnp.float32, -bound, bound)
        b = jax.random.uniform(kb, (1, fan_out), jnp.float32, -bound, bound)
        return w, b

    k1, k2, k3 = jax.random.split(key, 3)
    return {
        "l1": linear(k1, input_size, hidden_size),
        "l2": linear(k2, hidden_size, hidden_size),
        "l3": linear(k3, hidden_size, num_classes),
    }


def reference_forward(x, params):
    w1, b1 = params["l1"]
    w2, b2 = params["l2"]
    w3, b3 = params["l3"]
    h1 = jnp.maximum(x @ w1 + b1, 0.0)
    h2 = jnp.maximum(h1 @ w2 + b2, 0.0)
    return h2 @ w3 + b3


if __name__ == "__main__":
    batch, input_size, hidden_size, num_classes = 8, 32, 32, 16

    key = jax.random.PRNGKey(0)
    kx, kp = jax.random.split(key)
    x = jax.random.normal(kx, (batch, input_size), jnp.float32)
    params = init_params(kp, input_size, hidden_size, num_classes)

    out = neural_net_forward(x, params)
    out = jax.block_until_ready(out)

    ref = reference_forward(x, params)
    assert out.shape == (batch, num_classes)
    assert jnp.allclose(out, ref, atol=1e-5, rtol=1e-5), "mismatch vs JAX reference"
    print("KERNEL_OK")
</pallas_src>

<mosaic_0001>
module attributes {stable_mosaic.version = 11 : i64} {
  func.func @_mlp_kernel(%arg0: i32, %arg1: memref<8x128xf32, #tpu.memory_space<vmem>>, %arg2: memref<128x128xf32, #tpu.memory_space<vmem>>, %arg3: memref<128x128xf32, #tpu.memory_space<vmem>>, %arg4: memref<128x128xf32, #tpu.memory_space<vmem>>, %arg5: memref<8x128xf32, #tpu.memory_space<vmem>>, %arg6: memref<8x128xf32, #tpu.memory_space<vmem>>) attributes {dimension_semantics = [#tpu.dimension_semantics<parallel>], iteration_bounds = array<i64: 1>, scalar_prefetch = 0 : i64, scratch_operands = 0 : i64, tpu.core_type = #tpu.core_type<tc>, window_params = [{transform_indices = @transform_0, window_bounds = array<i64: 8, 128>}, {pipeline_mode = #tpu.pipeline_mode<synchronous>, transform_indices = @transform_1, window_bounds = array<i64: 128, 128>}, {pipeline_mode = #tpu.pipeline_mode<synchronous>, transform_indices = @transform_2, window_bounds = array<i64: 128, 128>}, {pipeline_mode = #tpu.pipeline_mode<synchronous>, transform_indices = @transform_3, window_bounds = array<i64: 128, 128>}, {pipeline_mode = #tpu.pipeline_mode<synchronous>, transform_indices = @transform_4, window_bounds = array<i64: 8, 128>}, {transform_indices = @transform_5, window_bounds = array<i64: 8, 128>}]} {
    %c0 = arith.constant 0 : index
    %c0_0 = arith.constant 0 : index
    %0 = vector.load %arg1[%c0, %c0_0] : memref<8x128xf32, #tpu.memory_space<vmem>>, vector<8x128xf32>
    %c0_1 = arith.constant 0 : index
    %c0_2 = arith.constant 0 : index
    %1 = vector.load %arg2[%c0_1, %c0_2] : memref<128x128xf32, #tpu.memory_space<vmem>>, vector<128x128xf32>
    %cst = arith.constant dense<0.000000e+00> : vector<8x128xf32>
    %2 = tpu.matmul %0, %1, %cst {dimension_numbers = #tpu.dot_dimension_numbers<[1], [0], [0], [1], [0, 0, 1, 1], [], []>} : vector<8x128xf32>, vector<128x128xf32>, vector<8x128xf32> -> vector<8x128xf32>
    %c0_3 = arith.constant 0 : index
    %c0_4 = arith.constant 0 : index
    %3 = vector.load %arg5[%c0_3, %c0_4] : memref<8x128xf32, #tpu.memory_space<vmem>>, vector<1x128xf32>
    %4 = vector.broadcast %3 : vector<1x128xf32> to vector<8x128xf32>
    %5 = arith.addf %2, %4 : vector<8x128xf32>
    %cst_5 = arith.constant 0.000000e+00 : f32
    %6 = vector.broadcast %cst_5 : f32 to vector<8x128xf32>
    %7 = arith.maximumf %5, %6 : vector<8x128xf32>
    %c0_6 = arith.constant 0 : index
    %c0_7 = arith.constant 0 : index
    %8 = vector.load %arg3[%c0_6, %c0_7] : memref<128x128xf32, #tpu.memory_space<vmem>>, vector<128x128xf32>
    %cst_8 = arith.constant dense<0.000000e+00> : vector<8x128xf32>
    %9 = tpu.matmul %7, %8, %cst_8 {dimension_numbers = #tpu.dot_dimension_numbers<[1], [0], [0], [1], [0, 0, 1, 1], [], []>} : vector<8x128xf32>, vector<128x128xf32>, vector<8x128xf32> -> vector<8x128xf32>
    %c1 = arith.constant 1 : index
    %c0_9 = arith.constant 0 : index
    %10 = vector.load %arg5[%c1, %c0_9] : memref<8x128xf32, #tpu.memory_space<vmem>>, vector<1x128xf32>
    %11 = vector.broadcast %10 : vector<1x128xf32> to vector<8x128xf32>
    %12 = arith.addf %9, %11 : vector<8x128xf32>
    %cst_10 = arith.constant 0.000000e+00 : f32
    %13 = vector.broadcast %cst_10 : f32 to vector<8x128xf32>
    %14 = arith.maximumf %12, %13 : vector<8x128xf32>
    %c0_11 = arith.constant 0 : index
    %c0_12 = arith.constant 0 : index
    %15 = vector.load %arg4[%c0_11, %c0_12] : memref<128x128xf32, #tpu.memory_space<vmem>>, vector<128x128xf32>
    %cst_13 = arith.constant dense<0.000000e+00> : vector<8x128xf32>
    %16 = tpu.matmul %14, %15, %cst_13 {dimension_numbers = #tpu.dot_dimension_numbers<[1], [0], [0], [1], [0, 0, 1, 1], [], []>} : vector<8x128xf32>, vector<128x128xf32>, vector<8x128xf32> -> vector<8x128xf32>
    %c2 = arith.constant 2 : index
    %c0_14 = arith.constant 0 : index
    %17 = vector.load %arg5[%c2, %c0_14] : memref<8x128xf32, #tpu.memory_space<vmem>>, vector<1x128xf32>
    %18 = vector.broadcast %17 : vector<1x128xf32> to vector<8x128xf32>
    %19 = arith.addf %16, %18 : vector<8x128xf32>
    %c0_15 = arith.constant 0 : index
    %c0_16 = arith.constant 0 : index
    %20 = vector.load %arg6[%c0_15, %c0_16] : memref<8x128xf32, #tpu.memory_space<vmem>>, vector<8x128xf32>
    tpu.vector_store %arg6[%c0_15, %c0_16], %19 {strides = array<i32>} : memref<8x128xf32, #tpu.memory_space<vmem>>, vector<8x128xf32>,
    return
  }
  func.func @transform_0(%arg0: i32) -> (i32, i32) {
    %c0_i32 = arith.constant 0 : i32
    %c0_i32_0 = arith.constant 0 : i32
    return %arg0, %c0_i32 : i32, i32
  }
  func.func @transform_1(%arg0: i32) -> (i32, i32) {
    %c0_i32 = arith.constant 0 : i32
    %c0_i32_0 = arith.constant 0 : i32
    %c0_i32_1 = arith.constant 0 : i32
    return %c0_i32, %c0_i32_0 : i32, i32
  }
  func.func @transform_2(%arg0: i32) -> (i32, i32) {
    %c0_i32 = arith.constant 0 : i32
    %c0_i32_0 = arith.constant 0 : i32
    %c0_i32_1 = arith.constant 0 : i32
    return %c0_i32, %c0_i32_0 : i32, i32
  }
  func.func @transform_3(%arg0: i32) -> (i32, i32) {
    %c0_i32 = arith.constant 0 : i32
    %c0_i32_0 = arith.constant 0 : i32
    %c0_i32_1 = arith.constant 0 : i32
    return %c0_i32, %c0_i32_0 : i32, i32
  }
  func.func @transform_4(%arg0: i32) -> (i32, i32) {
    %c0_i32 = arith.constant 0 : i32
    %c0_i32_0 = arith.constant 0 : i32
    %c0_i32_1 = arith.constant 0 : i32
    return %c0_i32, %c0_i32_0 : i32, i32
  }
  func.func @transform_5(%arg0: i32) -> (i32, i32) {
    %c0_i32 = arith.constant 0 : i32
    %c0_i32_0 = arith.constant 0 : i32
    return %arg0, %c0_i32 : i32, i32
  }
}

</mosaic_0001>

<bundles_post_ra>
// kernel: tpu_custom_call.1
= control target key start
LH: loop header
LB: loop body
LE: loop exit
PB: predicated region body
PF: predicated region fallthrough
CT: control target
= control target key end

     0   :  { %10 = vsyncpa [#allocation3], 0  ;;  %s797_s0 = inlined_call_operand.hbm [shape: f32[8,128], index: 0, kind: input, shape index: {}]   ;;  %s798_s1 = inlined_call_operand.hbm [shape: f32[128,128], index: 1, kind: input, shape index: {}]   ;;  %s799_s2 = inlined_call_operand.hbm [shape: f32[128,128], index: 2, kind: input, shape index: {}]   ;;  %s800_s3 = inlined_call_operand.hbm [shape: f32[128,128], index: 3, kind: input, shape index: {}]   ;;  %s801_s4 = inlined_call_operand.hbm [shape: f32[8,128], index: 4, kind: input, shape index: {}]   ;;  %s802_s5 = inlined_call_operand.hbm [shape: f32[8,128], index: 5, kind: output, shape index: {}]  }
   0x1   :  { %11 = vsyncpa [#allocation6], 0 }
   0x2   :  { %12 = vsyncpa [#allocation9], 0 }
   0x3   :  { %13 = vsyncpa [#allocation4], 0  ;;  %s676_s18 = smov [#allocation5]  }
   0x4   :  { %s29_s19 = sshll.u32 %s676_s18, 4  ;;  %s30_s19 = int_to_ptr.vmem [resolvable:$true] %s29_s19 }
   0x5   :  { %s556_s20 = scalar_lea.vmem %s30_s19, 2048  ;;  %p561_p1 = scmp.lt.s32.totalorder %s30_s19, %s30_s19 }
   0x6   :  { %p557_p0 = scmp.ne.s32.totalorder %s30_s19, %s556_s20  ;;  %p562_p2 = scmp.lt.s32.totalorder %s556_s20, %s556_s20 }
   0x8   :  { %p563_p3 = por %p562_p2, %p561_p1 }
   0xa   :  { %p564_p4 = pnand %p563_p3, %p557_p0 }
   0xc   :  { %567 = shalt.err (!%p564_p4)
}
   0xd   :  { %s677_s21 = smov 128   ;;  %s678_s22 = smov 8  }
   0xe   :  { %35 = dma.hbm_to_vmem [thread:$0]  %s798_s1, 2048, %s30_s19, [#allocation6], %s677_s21, %s677_s21, %s678_s22  }
   0xf   :  { %s679_s25 = smov [#allocation8]   ;;  %s680_s27 = smov [#allocation2]  }
  0x10   :  { %s53_s26 = sshll.u32 %s679_s25, 4  ;;  %s20_s28 = sshll.u32 %s680_s27, 4  ;;  %s54_s26 = int_to_ptr.vmem [resolvable:$true] %s53_s26  ;;  %s21_s28 = int_to_ptr.vmem [resolvable:$true] %s20_s28 }
  0x11   :  { %s576_s29 = scalar_lea.vmem %s54_s26, 2048  ;;  %p581_p6 = scmp.lt.s32.totalorder %s54_s26, %s54_s26 }
  0x12   :  { %p577_p5 = scmp.ne.s32.totalorder %s54_s26, %s576_s29  ;;  %p582_p7 = scmp.lt.s32.totalorder %s576_s29, %s576_s29 }
  0x14   :  { %p583_p8 = por %p582_p7, %p581_p6 }
  0x16   :  { %p584_p9 = pnand %p583_p8, %p577_p5 }
  0x18   :  { %587 = shalt.err (!%p584_p9)
}
  0x19   :  { %59 = dma.hbm_to_vmem [thread:$0]  %s800_s3, 2048, %s54_s26, [#allocation9], %s677_s21, %s677_s21, %s678_s22  }
  0x1a   :  { %s596_s1 = scalar_lea.vmem %s21_s28, 128  ;;  %p601_p11 = scmp.lt.s32.totalorder %s21_s28, %s21_s28 }
  0x1b   :  { %p597_p10 = scmp.ne.s32.totalorder %s21_s28, %s596_s1  ;;  %p602_p12 = scmp.lt.s32.totalorder %s596_s1, %s596_s1 }
  0x1d   :  { %p603_p13 = por %p602_p12, %p601_p11 }
  0x1f   :  { %p604_p0 = pnand %p603_p13, %p597_p10 }
  0x21   :  { %607 = shalt.err (!%p604_p0)
}
  0x22   :  { %23 = dma.hbm_to_vmem [thread:$0]  %s797_s0, 128, %s21_s28, [#allocation3]  }
  0x23   :  { %s681_s9 = smov [#allocation7]   ;;  %s682_s11 = smov [#allocation10]  }
  0x24   :  { %s41_s10 = sshll.u32 %s681_s9, 4  ;;  %s66_s12 = sshll.u32 %s682_s11, 4  ;;  %s42_s10 = int_to_ptr.vmem [resolvable:$true] %s41_s10  ;;  %s67_s12 = int_to_ptr.vmem [resolvable:$true] %s66_s12 }
  0x25   :  { %s616_s13 = scalar_lea.vmem %s42_s10, 2048  ;;  %p621_p2 = scmp.lt.s32.totalorder %s42_s10, %s42_s10 }
  0x26   :  { %p617_p1 = scmp.ne.s32.totalorder %s42_s10, %s616_s13  ;;  %p622_p3 = scmp.lt.s32.totalorder %s616_s13, %s616_s13 }
  0x28   :  { %p623_p4 = por %p622_p3, %p621_p2 }
  0x2a   :  { %p624_p5 = pnand %p623_p4, %p617_p1 }
  0x2c   :  { %627 = shalt.err (!%p624_p5)
}
  0x2d   :  { %47 = dma.hbm_to_vmem [thread:$0]  %s799_s2, 2048, %s42_s10, [#allocation6], %s677_s21, %s677_s21, %s678_s22  }
  0x2e   :  { %s636_s0 = scalar_lea.vmem %s67_s12, 128  ;;  %p641_p7 = scmp.lt.s32.totalorder %s67_s12, %s67_s12 }
  0x2f   :  { %p637_p6 = scmp.ne.s32.totalorder %s67_s12, %s636_s0  ;;  %p642_p8 = scmp.lt.s32.totalorder %s636_s0, %s636_s0 }
  0x31   :  { %p643_p9 = por %p642_p8, %p641_p7 }
  0x33   :  { %p644_p10 = pnand %p643_p9, %p637_p6 }
  0x35   :  { %647 = shalt.err (!%p644_p10)
}
  0x36   :  { %69 = dma.hbm_to_vmem [thread:$0]  %s801_s4, 128, %s67_s12, [#allocation9]  }
  0x37   :  { %668 = dma.done.wait [#allocation3], 128  }
  0x38   :  { %669 = vsyncadd [#allocation3], 4294967168 }
  0x39   :  { %670 = dma.done.wait [#allocation6], 4096  }
  0x3a   :  { %671 = vsyncadd [#allocation6], 4294963200 }
  0x3b   :  { %672 = dma.done.wait [#allocation9], 2176  }
  0x3c   :  { %673 = vsyncadd [#allocation9], 4294965120  ;;  %v683_v0 = vmov 0.0   ;;  %vm684_vm0 = vmmov 0   ;;  %v101_v1 = vld [vmem:[#allocation5 + $0x78] sm:$0xff]  ;;  %v100_v2 = vld [vmem:[#allocation5 + $0x70] sm:$0xff] }
  0x3d   :  { %433 = vmatprep.subr.mxu0 %v683_v0  ;;  %465 = vmatprep.mubr.msk.f32.mxu0 %vm684_vm0, %v683_v0  ;;  %v99_v3 = vld [vmem:[#allocation5 + $0x68] sm:$0xff]  ;;  %v98_v4 = vld [vmem:[#allocation5 + $0x60] sm:$0xff]  ;;  %v193_v5 = vld [vmem:[#allocation7 + $0x78] sm:$0xff]  ;;  %s685_s2 = smov [#allocation11]  }
  0x3e   :  { %468 = vmatprep.subr.mxu1 %v683_v0  ;;  %500 = vmatprep.mubr.msk.f32.mxu1 %vm684_vm0, %v683_v0  ;;  %v97_v6 = vld [vmem:[#allocation5 + $0x58] sm:$0xff]  ;;  %v192_v7 = vld [vmem:[#allocation7 + $0x70] sm:$0xff]  ;;  %v191_v8 = vld [vmem:[#allocation7 + $0x68] sm:$0xff]  ;;  %s368_s4 = sshll.u32 %s685_s2, 4  ;;  %s369_s4 = int_to_ptr.vmem [resolvable:$true] %s368_s4 }
  0x3f   :  { %434 = vmatpush3.msra.mxu0 %v101_v1  ;;  %469 = vmatpush3.msra.mxu1 %v193_v5  ;;  %v96_v9 = vld [vmem:[#allocation5 + $0x50] sm:$0xff]  ;;  %v190_v10 = vld [vmem:[#allocation7 + $0x60] sm:$0xff]  ;;  %v95_v11 = vld [vmem:[#allocation5 + $0x48] sm:$0xff]  ;;  %s648_s17 = scalar_lea.vmem %s369_s4, 128  ;;  %p653_p12 = scmp.lt.s32.totalorder %s369_s4, %s369_s4 }
  0x40   :  { %435 = vmatprep.subr.mxu0 %v683_v0  ;;  %470 = vmatprep.subr.mxu1 %v683_v0  ;;  %v189_v12 = vld [vmem:[#allocation7 + $0x58] sm:$0xff]  ;;  %v94_v13 = vld [vmem:[#allocation5 + $0x40] sm:$0xff]  ;;  %v188_v14 = vld [vmem:[#allocation7 + $0x50] sm:$0xff]  ;;  %p649_p11 = scmp.ne.s32.totalorder %s369_s4, %s648_s17  ;;  %p654_p13 = scmp.lt.s32.totalorder %s648_s17, %s648_s17 }
  0x41   :  { %436 = vmatpush3.msra.mxu0 %v100_v2  ;;  %471 = vmatpush3.msra.mxu1 %v192_v7  ;;  %v93_v15 = vld [vmem:[#allocation5 + $0x38] sm:$0xff]  ;;  %v187_v16 = vld [vmem:[#allocation7 + $0x48] sm:$0xff]  ;;  %v92_v17 = vld [vmem:[#allocation5 + $0x30] sm:$0xff] }
  0x42   :  { %437 = vmatprep.subr.mxu0 %v683_v0  ;;  %472 = vmatprep.subr.mxu1 %v683_v0  ;;  %v186_v18 = vld [vmem:[#allocation7 + $0x40] sm:$0xff]  ;;  %v91_v19 = vld [vmem:[#allocation5 + $0x28] sm:$0xff]  ;;  %v185_v20 = vld [vmem:[#allocation7 + $0x38] sm:$0xff]  ;;  %p655_p0 = por %p654_p13, %p653_p12 }
  0x43   :  { %438 = vmatpush3.msra.mxu0 %v99_v3  ;;  %473 = vmatpush3.msra.mxu1 %v191_v8  ;;  %v90_v21 = vld [vmem:[#allocation5 + $0x20] sm:$0xff]  ;;  %v184_v22 = vld [vmem:[#allocation7 + $0x30] sm:$0xff]  ;;  %v89_v23 = vld [vmem:[#allocation5 + $0x18] sm:$0xff] }
  0x44   :  { %439 = vmatprep.subr.mxu0 %v683_v0  ;;  %474 = vmatprep.subr.mxu1 %v683_v0  ;;  %v183_v24 = vld [vmem:[#allocation7 + $0x28] sm:$0xff]  ;;  %v88_v25 = vld [vmem:[#allocation5 + $0x10] sm:$0xff]  ;;  %v182_v26 = vld [vmem:[#allocation7 + $0x20] sm:$0xff]  ;;  %p656_p1 = pnand %p655_p0, %p649_p11 }
  0x45   :  { %440 = vmatpush3.msra.mxu0 %v98_v4  ;;  %475 = vmatpush3.msra.mxu1 %v190_v10  ;;  %v87_v27 = vld [vmem:[#allocation5 + $0x8] sm:$0xff]  ;;  %v181_v28 = vld [vmem:[#allocation7 + $0x18] sm:$0xff]  ;;  %v86_v29 = vld [vmem:[#allocation5] sm:$0xff] }
  0x46   :  { %441 = vmatprep.subr.mxu0 %v683_v0  ;;  %476 = vmatprep.subr.mxu1 %v683_v0  ;;  %v85_v30 = vld [vmem:[#allocation2] sm:$0xff]  ;;  %v180_v31 = vld [vmem:[#allocation7 + $0x10] sm:$0xff]  ;;  %v179_v32 = vld [vmem:[#allocation7 + $0x8] sm:$0xff] }
  0x47   :  { %442 = vmatpush3.msra.mxu0 %v97_v6  ;;  %477 = vmatpush3.msra.mxu1 %v189_v12  ;;  %v178_v33 = vld [vmem:[#allocation7] sm:$0xff]  ;;  %v285_v34 = vld [vmem:[#allocation8 + $0x78] sm:$0xff]  ;;  %v284_v35 = vld [vmem:[#allocation8 + $0x70] sm:$0xff] }
  0x48   :  { %443 = vmatprep.subr.mxu0 %v683_v0  ;;  %478 = vmatprep.subr.mxu1 %v683_v0  ;;  %v283_v36 = vld [vmem:[#allocation8 + $0x68] sm:$0xff]  ;;  %v282_v37 = vld [vmem:[#allocation8 + $0x60] sm:$0xff]  ;;  %v281_v38 = vld [vmem:[#allocation8 + $0x58] sm:$0xff] }
  0x49   :  { %444 = vmatpush3.msra.mxu0 %v96_v9  ;;  %479 = vmatpush3.msra.mxu1 %v188_v14  ;;  %v280_v39 = vld [vmem:[#allocation8 + $0x50] sm:$0xff]  ;;  %v279_v40 = vld [vmem:[#allocation8 + $0x48] sm:$0xff]  ;;  %v278_v41 = vld [vmem:[#allocation8 + $0x40] sm:$0xff] }
  0x4a   :  { %445 = vmatprep.subr.mxu0 %v683_v0  ;;  %480 = vmatprep.subr.mxu1 %v683_v0  ;;  %v277_v42 = vld [vmem:[#allocation8 + $0x38] sm:$0xff]  ;;  %v276_v43 = vld [vmem:[#allocation8 + $0x30] sm:$0xff]  ;;  %v275_v44 = vld [vmem:[#allocation8 + $0x28] sm:$0xff] }
  0x4b   :  { %446 = vmatpush3.msra.mxu0 %v95_v11  ;;  %481 = vmatpush3.msra.mxu1 %v187_v16  ;;  %v274_v45 = vld [vmem:[#allocation8 + $0x20] sm:$0xff]  ;;  %v273_v46 = vld [vmem:[#allocation8 + $0x18] sm:$0xff]  ;;  %v272_v52 = vld [vmem:[#allocation8 + $0x10] sm:$0xff] }
  0x4c   :  { %447 = vmatprep.subr.mxu0 %v683_v0  ;;  %482 = vmatprep.subr.mxu1 %v683_v0  ;;  %v379_v47 = vld [vmem:[#allocation10] ss:$0 sm:$0xff]  ;;  %v271_v53 = vld [vmem:[#allocation8 + $0x8] sm:$0xff]  ;;  %v380_v55 = vld [vmem:[#allocation10 + $0x1] ss:$0 sm:$0xff] }
  0x4d   :  { %448 = vmatpush3.msra.mxu0 %v94_v13  ;;  %483 = vmatpush3.msra.mxu1 %v186_v18  ;;  %v270_v54 = vld [vmem:[#allocation8] sm:$0xff] }
  0x4e   :  { %449 = vmatprep.subr.mxu0 %v683_v0  ;;  %484 = vmatprep.subr.mxu1 %v683_v0  ;;  %v381_v60 = vld [vmem:[#allocation10 + $0x2] ss:$0 sm:$0xff] }
  0x4f   :  { %450 = vmatpush3.msra.mxu0 %v93_v15  ;;  %485 = vmatpush3.msra.mxu1 %v185_v20 }
  0x50   :  { %451 = vmatprep.subr.mxu0 %v683_v0  ;;  %486 = vmatprep.subr.mxu1 %v683_v0 }
  0x51   :  { %452 = vmatpush3.msra.mxu0 %v92_v17  ;;  %487 = vmatpush3.msra.mxu1 %v184_v22 }
  0x52   :  { %453 = vmatprep.subr.mxu0 %v683_v0  ;;  %488 = vmatprep.subr.mxu1 %v683_v0 }
  0x53   :  { %454 = vmatpush3.msra.mxu0 %v91_v19  ;;  %489 = vmatpush3.msra.mxu1 %v183_v24 }
  0x54   :  { %455 = vmatprep.subr.mxu0 %v683_v0  ;;  %490 = vmatprep.subr.mxu1 %v683_v0 }
  0x55   :  { %456 = vmatpush3.msra.mxu0 %v90_v21  ;;  %491 = vmatpush3.msra.mxu1 %v182_v26 }
  0x56   :  { %457 = vmatprep.subr.mxu0 %v683_v0  ;;  %492 = vmatprep.subr.mxu1 %v683_v0 }
  0x57   :  { %458 = vmatpush3.msra.mxu0 %v89_v23  ;;  %493 = vmatpush3.msra.mxu1 %v181_v28 }
  0x58   :  { %459 = vmatprep.subr.mxu0 %v683_v0  ;;  %494 = vmatprep.subr.mxu1 %v683_v0 }
  0x59   :  { %460 = vmatpush3.msra.mxu0 %v88_v25  ;;  %495 = vmatpush3.msra.mxu1 %v180_v31 }
  0x5a   :  { %461 = vmatprep.subr.mxu0 %v683_v0  ;;  %496 = vmatprep.subr.mxu1 %v683_v0 }
  0x5b   :  { %462 = vmatpush3.msra.mxu0 %v87_v27  ;;  %497 = vmatpush3.msra.mxu1 %v179_v32 }
  0x5c   :  { %463 = vmatprep.subr.mxu0 %v683_v0  ;;  %498 = vmatprep.subr.mxu1 %v683_v0 }
  0x5d   :  { %464 = vmatpush3.msra.mxu0 %v86_v29  ;;  %499 = vmatpush3.msra.mxu1 %v178_v33 }
  0x5e   :  { %466 = vmatmul.mubr.f32.vlgmr.msra.gmra.mxu0 %v85_v30  ;;  %503 = vmatprep.subr.mxu0 %v683_v0 }
  0x5f   :  { %535 = vmatprep.mubr.msk.f32.mxu0 %vm684_vm0, %v683_v0  ;;  %504 = vmatpush3.msra.mxu0 %v285_v34 }
  0x60   :  { %505 = vmatprep.subr.mxu0 %v683_v0 }
  0x61   :  { %506 = vmatpush3.msra.mxu0 %v284_v35 }
  0x62   :  { %507 = vmatprep.subr.mxu0 %v683_v0 }
  0x63   :  { %508 = vmatpush3.msra.mxu0 %v283_v36 }
  0x64   :  { %509 = vmatprep.subr.mxu0 %v683_v0 }
  0x65   :  { %510 = vmatpush3.msra.mxu0 %v282_v37 }
  0x66   :  { %511 = vmatprep.subr.mxu0 %v683_v0 }
  0x67   :  { %512 = vmatpush3.msra.mxu0 %v281_v38 }
  0x68   :  { %513 = vmatprep.subr.mxu0 %v683_v0 }
  0x69   :  { %514 = vmatpush3.msra.mxu0 %v280_v39 }
  0x6a   :  { %515 = vmatprep.subr.mxu0 %v683_v0 }
  0x6b   :  { %516 = vmatpush3.msra.mxu0 %v279_v40 }
  0x6c   :  { %517 = vmatprep.subr.mxu0 %v683_v0 }
  0x6d   :  { %518 = vmatpush3.msra.mxu0 %v278_v41 }
  0x6e   :  { %519 = vmatprep.subr.mxu0 %v683_v0 }
  0x6f   :  { %520 = vmatpush3.msra.mxu0 %v277_v42 }
  0x70   :  { %521 = vmatprep.subr.mxu0 %v683_v0 }
  0x71   :  { %522 = vmatpush3.msra.mxu0 %v276_v43 }
  0x72   :  { %523 = vmatprep.subr.mxu0 %v683_v0 }
  0x73   :  { %524 = vmatpush3.msra.mxu0 %v275_v44 }
  0x74   :  { %525 = vmatprep.subr.mxu0 %v683_v0 }
  0x75   :  { %526 = vmatpush3.msra.mxu0 %v274_v45 }
  0x76   :  { %527 = vmatprep.subr.mxu0 %v683_v0 }
  0x77   :  { %528 = vmatpush3.msra.mxu0 %v273_v46 }
  0x78   :  { %529 = vmatprep.subr.mxu0 %v683_v0 }
  0x79   :  { %530 = vmatpush3.msra.mxu0 %v272_v52 }
  0x7a   :  { %531 = vmatprep.subr.mxu0 %v683_v0 }
  0x7b   :  { %532 = vmatpush3.msra.mxu0 %v271_v53 }
  0x7c   :  { %533 = vmatprep.subr.mxu0 %v683_v0 }
  0x7d   :  { %534 = vmatpush3.msra.mxu0 %v270_v54 }
 0x11e   :  { %v173_v48 = vpop.f32.mrf.mxu0 }
 0x11f   :  { %v174_v49 = vadd.f32 %v379_v47, %v173_v48 }
 0x120   :  { %v467_v50 = vpop.f32.mrf.mxu0 }
 0x121   :  { %v177_v51 = vmax.f32 %v174_v49, 0.0 }
 0x123   :  { %501 = vmatmul.mubr.f32.vlgmr.msra.gmra.mxu1 %v177_v51 }
 0x1e3   :  { %v265_v56 = vpop.f32.mrf.mxu1 }
 0x1e4   :  { %v266_v57 = vadd.f32 %v380_v55, %v265_v56 }
 0x1e5   :  { %v502_v58 = vpop.f32.mrf.mxu1 }
 0x1e6   :  { %v269_v59 = vmax.f32 %v266_v57, 0.0 }
 0x1e8   :  { %536 = vmatmul.mubr.f32.vlgmr.msra.gmra.mxu0 %v269_v59 }
 0x2a8   :  { %v357_v61 = vpop.f32.mrf.mxu0 }
 0x2a9   :  { %v358_v62 = vadd.f32 %v381_v60, %v357_v61 }
 0x2aa   :  { %v537_v63 = vpop.f32.mrf.mxu0 }
 0x2ab   :  { %361 = vst [vmem:[#allocation11] sm:$0xff] %v358_v62 }
 0x2ac   :  { %659 = shalt.err (!%p656_p1)
}
 0x2ad   :  { %371 = dma.vmem_to_hbm [thread:$0]  %s369_s4, 128, %s802_s5, [#allocation4]  }
 0x2ae   :  { %674 = dma.done.wait [#allocation4], 128  }
 0x2af   :  { %675 = vsyncadd [#allocation4], 4294967168 }
 0x2b0   :  { %375 = vsyncpa [#allocation3], 1 }
 0x2b1   :  { %376 = vsyncpa [#allocation6], 1 }
 0x2b2   :  { %377 = vsyncpa [#allocation9], 1 }
 0x2b3   :  { %378 = vsyncpa [#allocation4], 1 }

</bundles_post_ra>
